<compile_context>
chip_gen: v7x
topology: tpu7x:2x2x1
jax: 0.10.0
libtpu: 0.0.40
codegen_flags: <defaults>
</compile_context>

<pallas_src>
import jax
import jax.numpy as jnp
import numpy as np
from jax.experimental import pallas as pl
from jax.experimental.pallas import tpu as pltpu


def _pairwise_kernel(recv_ref, send_ref, wcat_ref, bcat_ref, o_ref):
    # recv_ref: (1, D, TP, W)  receiver projection (+ b_out folded).
    #                          W == TL : small-N lane-packed slab (values pre-placed per
    #                                    lane group -> no cross-lane op in the hot loop)
    #                          W == 1  : large-N column, lane-broadcast by the add below
    # send_ref: (1, D, TL)     sender projection row per feature d (j on the lane axis)
    # wcat_ref: SMEM (D,)      fc_cat weight
    # bcat_ref: SMEM (1,)      fc_cat bias
    # o_ref:    (1, TP, TL)    lane-dense output tile
    d_dim = recv_ref.shape[1]
    tp = recv_ref.shape[2]
    tl = send_ref.shape[2]

    bcat = bcat_ref[0]
    acc = jnp.zeros((tp, tl), jnp.float32)

    def contrib(d):
        r = recv_ref[0, d]                         # (TP, W)
        s = send_ref[0, d].reshape(1, tl)          # (1, TL): cheap sublane broadcast
        # relu(fc_out) restricted to feature d, then the fc_cat contraction term.
        return jnp.maximum(r + s, 0.0) * wcat_ref[d]

    if d_dim <= 32:
        # Small D: fully unrolled so the LLO scheduler can fill all 4 VALU slots.
        for d in range(d_dim):
            acc = acc + contrib(d)
    else:
        # Large D: bound code size, keep enough unroll for slot filling.
        acc = jax.lax.fori_loop(0, d_dim, lambda d, a: a + contrib(d), acc, unroll=8)

    o_ref[0] = jnp.maximum(acc + bcat, 0.0)        # relu(fc_cat), lane-dense store


def _pick_pack(n):
    """Lane-packing factor LP: pack LP i-rows onto the 128-lane axis when N < 128."""
    if n >= 128:
        return 1
    for lp in range(1, n + 1):
        if n % lp == 0 and (lp * n) % 128 == 0:
            return lp
    return 1  # no clean packing (e.g. odd N): unpacked fallback


def _pick_tile(n, align, cap):
    """Largest multiple of `align` that divides n and is <= cap; else n (full dim)."""
    t = cap - cap % align
    while t >= align:
        if n % t == 0:
            return t
        t -= align
    return n


def _pad(n, m):
    return ((n + m - 1) // m) * m


def embed2graph_by_linear(x, w_out, b_out, w_cat, b_cat):
    """x: (B, N, D); w_out: (D, 2D); b_out: (D,); w_cat: (1, D); b_cat: (1,).

    Returns m of shape (B, N, N, 1), matching the torch module's output.
    """
    B, N, D = x.shape
    f32 = jnp.float32
    x = x.astype(f32)
    w_out = w_out.astype(f32)
    b_out = b_out.astype(f32)
    w_cat = w_cat.astype(f32)
    b_cat = b_cat.astype(f32)

    hi = jax.lax.Precision.HIGHEST

    # fc_out([senders, receivers]) = senders @ Ws^T + receivers @ Wr^T + b_out
    ws = w_out[:, :D]                                   # applied to senders   x[j]
    wr = w_out[:, D:]                                   # applied to receivers x[i]
    w_fused = jnp.concatenate([ws.T, wr.T], axis=1)     # (D, 2D)
    proj = jnp.einsum("bnd,de->bne", x, w_fused, precision=hi)   # one batched MXU matmul
    send = proj[..., :D]                                # A[b, j, :]  (B, N, D)
    recv = proj[..., D:] + b_out                        # Bp[b, i, :] (B, N, D), bias folded

    # --- layout / packing ------------------------------------------------------------
    LP = _pick_pack(N)                                  # i-rows packed per lane group
    P, L = N // LP, LP * N                              # output viewed as (B, P, L)

    send_t = jnp.transpose(send, (0, 2, 1))             # (B, D, N), j on lanes
    send_op = jnp.tile(send_t, (1, 1, LP)) if LP > 1 else send_t    # (B, D, L): q -> q % N

    if LP > 1:
        # Pre-place receiver values per lane group: recv_op[b,d,p,q] = Bp[b, p*LP+q//N, d].
        r = recv.reshape(B, P, LP, D)
        r = jnp.transpose(r, (0, 3, 1, 2))              # (B, D, P, LP)
        recv_op = jnp.repeat(r, N, axis=3)              # (B, D, P, L)
        recv_w = None                                   # lane width == TL (set below)
    else:
        recv_op = jnp.transpose(recv, (0, 2, 1))[..., None]          # (B, D, N, 1)
        recv_w = 1

    # --- tiling (vreg-budget capped: TP*TL <= 32K f32 = 128 KiB) ----------------------
    TL = _pick_tile(L, 128, 256)
    tp_cap = max(8, min(64, (32 * 1024) // max(TL, 1)))
    TP = _pick_tile(P, 8, tp_cap)
    recv_lane = TL if recv_w is None else 1

    grid = (B, P // TP, L // TL)

    if recv_w is None:
        recv_map = lambda b, i, j: (b, 0, i, j)         # packed slab follows output lanes
    else:
        recv_map = lambda b, i, j: (b, 0, i, 0)         # single column, i-dependent only

    # --- VMEM budget (double-buffered blocks are tiny; cap well under v7x's 64 MiB) ---
    recv_bytes = 4 * D * _pad(TP, 8) * _pad(recv_lane, 128)
    send_bytes = 4 * _pad(D, 8) * _pad(TL, 128)
    out_bytes = 4 * _pad(TP, 8) * _pad(TL, 128)
    vmem_limit = int(min(32 * 2**20, max(4 * 2**20, 4 * (recv_bytes + send_bytes + out_bytes))))

    out = pl.pallas_call(
        _pairwise_kernel,
        out_shape=jax.ShapeDtypeStruct((B, P, L), jnp.float32),
        grid=grid,
        in_specs=[
            pl.BlockSpec((1, D, TP, recv_lane), recv_map),
            pl.BlockSpec((1, D, TL), lambda b, i, j: (b, 0, j)),
            pl.BlockSpec(memory_space=pltpu.MemorySpace.SMEM),
            pl.BlockSpec(memory_space=pltpu.MemorySpace.SMEM),
        ],
        out_specs=pl.BlockSpec((1, TP, TL), lambda b, i, j: (b, i, j)),
        compiler_params=pltpu.CompilerParams(
            dimension_semantics=("parallel", "parallel", "parallel"),
            vmem_limit_bytes=vmem_limit,
        ),
    )(recv_op, send_op, w_cat.reshape(-1), b_cat.reshape(-1))

    # (B, P, L) row-major is exactly (B, N, N); trailing singleton added outside the
    # kernel so in-kernel stores stay lane-dense (never width-1 masked stores).
    return out.reshape(B, N, N, 1)


def _reference(x, w_out, b_out, w_cat, b_cat):
    # Direct transcription of the torch forward (rel_rec / rel_send one-hot gathers).
    B, N, D = x.shape
    hi = jax.lax.Precision.HIGHEST
    receivers = jnp.repeat(x, N, axis=1)                   # edge e = i*N + j -> x[b, i]
    senders = jnp.tile(x, (1, N, 1))                       # edge e = i*N + j -> x[b, j]
    cat = jnp.concatenate([senders, receivers], axis=2)    # (B, N*N, 2D)
    h = jax.nn.relu(jnp.einsum("bef,df->bed", cat, w_out, precision=hi) + b_out)
    y = jax.nn.relu(jnp.einsum("bed,od->beo", h, w_cat, precision=hi) + b_cat)
    return y.reshape(B, N, N, 1)


if __name__ == "__main__":
    batch, roi_num, input_dim = 2, 16, 8

    key = jax.random.PRNGKey(0)
    kx, kx2, k1, k2, k3, k4 = jax.random.split(key, 6)

    x = jax.random.normal(kx, (batch, roi_num, input_dim), dtype=jnp.float32)

    # fc_out: Linear(2*input_dim, input_dim); fc_cat: Linear(input_dim, 1)
    lim_out = 1.0 / np.sqrt(2 * input_dim)
    lim_cat = 1.0 / np.sqrt(input_dim)
    w_out = jax.random.uniform(k1, (input_dim, 2 * input_dim), jnp.float32, -lim_out, lim_out)
    b_out = jax.random.uniform(k2, (input_dim,), jnp.float32, -lim_out, lim_out)
    w_cat = jax.random.uniform(k3, (1, input_dim), jnp.float32, -lim_cat, lim_cat)
    b_cat = jax.random.uniform(k4, (1,), jnp.float32, -lim_cat, lim_cat)

    # Small-N (lane-packed) path.
    m = jax.block_until_ready(embed2graph_by_linear(x, w_out, b_out, w_cat, b_cat))
    assert m.shape == (batch, roi_num, roi_num, 1)
    m_ref = _reference(x, w_out, b_out, w_cat, b_cat)
    np.testing.assert_allclose(np.asarray(m), np.asarray(m_ref), rtol=1e-5, atol=1e-5)

    # Also exercise the unpacked (N >= 128) path once, still at a small size.
    roi_big = 128
    xb = jax.random.normal(kx2, (batch, roi_big, input_dim), dtype=jnp.float32)
    mb = jax.block_until_ready(embed2graph_by_linear(xb, w_out, b_out, w_cat, b_cat))
    assert mb.shape == (batch, roi_big, roi_big, 1)
    mb_ref = _reference(xb, w_out, b_out, w_cat, b_cat)
    np.testing.assert_allclose(np.asarray(mb), np.asarray(mb_ref), rtol=1e-5, atol=1e-5)

    print("KERNEL_OK")
</pallas_src>

<mosaic_0001>
module attributes {stable_mosaic.version = 11 : i64} {
  func.func @_pairwise_kernel(%arg0: i32, %arg1: i32, %arg2: i32, %arg3: memref<1x8x2x128xf32, #tpu.memory_space<vmem>>, %arg4: memref<1x8x128xf32, #tpu.memory_space<vmem>>, %arg5: memref<8xf32, #tpu.memory_space<smem>>, %arg6: memref<1xf32, #tpu.memory_space<smem>>, %arg7: memref<1x2x128xf32, #tpu.memory_space<vmem>>) attributes {dimension_semantics = [#tpu.dimension_semantics<parallel>, #tpu.dimension_semantics<parallel>, #tpu.dimension_semantics<parallel>], iteration_bounds = array<i64: 2, 1, 1>, scalar_prefetch = 0 : i64, scratch_operands = 0 : i64, tpu.core_type = #tpu.core_type<tc>, window_params = [{transform_indices = @transform_0, window_bounds = array<i64: 1, 8, 2, 128>}, {transform_indices = @transform_1, window_bounds = array<i64: 1, 8, 128>}, {transform_indices = @transform_2, window_bounds = array<i64: 8>}, {transform_indices = @transform_3, window_bounds = array<i64: 1>}, {transform_indices = @transform_4, window_bounds = array<i64: 1, 2, 128>}]} {
    %c0 = arith.constant 0 : index
    %0 = memref.load %arg6[%c0] : memref<1xf32, #tpu.memory_space<smem>>
    %cst = arith.constant 0.000000e+00 : f32
    %1 = vector.broadcast %cst : f32 to vector<2x128xf32>
    %c0_0 = arith.constant 0 : index
    %c0_1 = arith.constant 0 : index
    %c0_2 = arith.constant 0 : index
    %c0_3 = arith.constant 0 : index
    %2 = vector.load %arg3[%c0_0, %c0_1, %c0_2, %c0_3] : memref<1x8x2x128xf32, #tpu.memory_space<vmem>>, vector<1x1x2x128xf32>
    %3 = vector.shape_cast %2 : vector<1x1x2x128xf32> to vector<2x128xf32>
    %c0_4 = arith.constant 0 : index
    %c0_5 = arith.constant 0 : index
    %c0_6 = arith.constant 0 : index
    %4 = vector.load %arg4[%c0_4, %c0_5, %c0_6] : memref<1x8x128xf32, #tpu.memory_space<vmem>>, vector<1x1x128xf32>
    %5 = vector.shape_cast %4 : vector<1x1x128xf32> to vector<128xf32>
    %6 = vector.shape_cast %5 : vector<128xf32> to vector<1x128xf32>
    %7 = vector.broadcast %6 : vector<1x128xf32> to vector<2x128xf32>
    %8 = arith.addf %3, %7 : vector<2x128xf32>
    %cst_7 = arith.constant 0.000000e+00 : f32
    %9 = vector.broadcast %cst_7 : f32 to vector<2x128xf32>
    %10 = arith.maximumf %8, %9 : vector<2x128xf32>
    %c0_8 = arith.constant 0 : index
    %11 = memref.load %arg5[%c0_8] : memref<8xf32, #tpu.memory_space<smem>>
    %12 = vector.broadcast %11 : f32 to vector<2x128xf32>
    %13 = arith.mulf %10, %12 : vector<2x128xf32>
    %14 = arith.addf %1, %13 : vector<2x128xf32>
    %c0_9 = arith.constant 0 : index
    %c1 = arith.constant 1 : index
    %c0_10 = arith.constant 0 : index
    %c0_11 = arith.constant 0 : index
    %15 = vector.load %arg3[%c0_9, %c1, %c0_10, %c0_11] : memref<1x8x2x128xf32, #tpu.memory_space<vmem>>, vector<1x1x2x128xf32>
    %16 = vector.shape_cast %15 : vector<1x1x2x128xf32> to vector<2x128xf32>
    %c0_12 = arith.constant 0 : index
    %c1_13 = arith.constant 1 : index
    %c0_14 = arith.constant 0 : index
    %17 = vector.load %arg4[%c0_12, %c1_13, %c0_14] : memref<1x8x128xf32, #tpu.memory_space<vmem>>, vector<1x1x128xf32>
    %18 = vector.shape_cast %17 : vector<1x1x128xf32> to vector<128xf32>
    %19 = vector.shape_cast %18 : vector<128xf32> to vector<1x128xf32>
    %20 = vector.broadcast %19 : vector<1x128xf32> to vector<2x128xf32>
    %21 = arith.addf %16, %20 : vector<2x128xf32>
    %cst_15 = arith.constant 0.000000e+00 : f32
    %22 = vector.broadcast %cst_15 : f32 to vector<2x128xf32>
    %23 = arith.maximumf %21, %22 : vector<2x128xf32>
    %c1_16 = arith.constant 1 : index
    %24 = memref.load %arg5[%c1_16] : memref<8xf32, #tpu.memory_space<smem>>
    %25 = vector.broadcast %24 : f32 to vector<2x128xf32>
    %26 = arith.mulf %23, %25 : vector<2x128xf32>
    %27 = arith.addf %14, %26 : vector<2x128xf32>
    %c0_17 = arith.constant 0 : index
    %c2 = arith.constant 2 : index
    %c0_18 = arith.constant 0 : index
    %c0_19 = arith.constant 0 : index
    %28 = vector.load %arg3[%c0_17, %c2, %c0_18, %c0_19] : memref<1x8x2x128xf32, #tpu.memory_space<vmem>>, vector<1x1x2x128xf32>
    %29 = vector.shape_cast %28 : vector<1x1x2x128xf32> to vector<2x128xf32>
    %c0_20 = arith.constant 0 : index
    %c2_21 = arith.constant 2 : index
    %c0_22 = arith.constant 0 : index
    %30 = vector.load %arg4[%c0_20, %c2_21, %c0_22] : memref<1x8x128xf32, #tpu.memory_space<vmem>>, vector<1x1x128xf32>
    %31 = vector.shape_cast %30 : vector<1x1x128xf32> to vector<128xf32>
    %32 = vector.shape_cast %31 : vector<128xf32> to vector<1x128xf32>
    %33 = vector.broadcast %32 : vector<1x128xf32> to vector<2x128xf32>
    %34 = arith.addf %29, %33 : vector<2x128xf32>
    %cst_23 = arith.constant 0.000000e+00 : f32
    %35 = vector.broadcast %cst_23 : f32 to vector<2x128xf32>
    %36 = arith.maximumf %34, %35 : vector<2x128xf32>
    %c2_24 = arith.constant 2 : index
    %37 = memref.load %arg5[%c2_24] : memref<8xf32, #tpu.memory_space<smem>>
    %38 = vector.broadcast %37 : f32 to vector<2x128xf32>
    %39 = arith.mulf %36, %38 : vector<2x128xf32>
    %40 = arith.addf %27, %39 : vector<2x128xf32>
    %c0_25 = arith.constant 0 : index
    %c3 = arith.constant 3 : index
    %c0_26 = arith.constant 0 : index
    %c0_27 = arith.constant 0 : index
    %41 = vector.load %arg3[%c0_25, %c3, %c0_26, %c0_27] : memref<1x8x2x128xf32, #tpu.memory_space<vmem>>, vector<1x1x2x128xf32>
    %42 = vector.shape_cast %41 : vector<1x1x2x128xf32> to vector<2x128xf32>
    %c0_28 = arith.constant 0 : index
    %c3_29 = arith.constant 3 : index
    %c0_30 = arith.constant 0 : index
    %43 = vector.load %arg4[%c0_28, %c3_29, %c0_30] : memref<1x8x128xf32, #tpu.memory_space<vmem>>, vector<1x1x128xf32>
    %44 = vector.shape_cast %43 : vector<1x1x128xf32> to vector<128xf32>
    %45 = vector.shape_cast %44 : vector<128xf32> to vector<1x128xf32>
    %46 = vector.broadcast %45 : vector<1x128xf32> to vector<2x128xf32>
    %47 = arith.addf %42, %46 : vector<2x128xf32>
    %cst_31 = arith.constant 0.000000e+00 : f32
    %48 = vector.broadcast %cst_31 : f32 to vector<2x128xf32>
    %49 = arith.maximumf %47, %48 : vector<2x128xf32>
    %c3_32 = arith.constant 3 : index
    %50 = memref.load %arg5[%c3_32] : memref<8xf32, #tpu.memory_space<smem>>
    %51 = vector.broadcast %50 : f32 to vector<2x128xf32>
    %52 = arith.mulf %49, %51 : vector<2x128xf32>
    %53 = arith.addf %40, %52 : vector<2x128xf32>
    %c0_33 = arith.constant 0 : index
    %c4 = arith.constant 4 : index
    %c0_34 = arith.constant 0 : index
    %c0_35 = arith.constant 0 : index
    %54 = vector.load %arg3[%c0_33, %c4, %c0_34, %c0_35] : memref<1x8x2x128xf32, #tpu.memory_space<vmem>>, vector<1x1x2x128xf32>
    %55 = vector.shape_cast %54 : vector<1x1x2x128xf32> to vector<2x128xf32>
    %c0_36 = arith.constant 0 : index
    %c4_37 = arith.constant 4 : index
    %c0_38 = arith.constant 0 : index
    %56 = vector.load %arg4[%c0_36, %c4_37, %c0_38] : memref<1x8x128xf32, #tpu.memory_space<vmem>>, vector<1x1x128xf32>
    %57 = vector.shape_cast %56 : vector<1x1x128xf32> to vector<128xf32>
    %58 = vector.shape_cast %57 : vector<128xf32> to vector<1x128xf32>
    %59 = vector.broadcast %58 : vector<1x128xf32> to vector<2x128xf32>
    %60 = arith.addf %55, %59 : vector<2x128xf32>
    %cst_39 = arith.constant 0.000000e+00 : f32
    %61 = vector.broadcast %cst_39 : f32 to vector<2x128xf32>
    %62 = arith.maximumf %60, %61 : vector<2x128xf32>
    %c4_40 = arith.constant 4 : index
    %63 = memref.load %arg5[%c4_40] : memref<8xf32, #tpu.memory_space<smem>>
    %64 = vector.broadcast %63 : f32 to vector<2x128xf32>
    %65 = arith.mulf %62, %64 : vector<2x128xf32>
    %66 = arith.addf %53, %65 : vector<2x128xf32>
    %c0_41 = arith.constant 0 : index
    %c5 = arith.constant 5 : index
    %c0_42 = arith.constant 0 : index
    %c0_43 = arith.constant 0 : index
    %67 = vector.load %arg3[%c0_41, %c5, %c0_42, %c0_43] : memref<1x8x2x128xf32, #tpu.memory_space<vmem>>, vector<1x1x2x128xf32>
    %68 = vector.shape_cast %67 : vector<1x1x2x128xf32> to vector<2x128xf32>
    %c0_44 = arith.constant 0 : index
    %c5_45 = arith.constant 5 : index
    %c0_46 = arith.constant 0 : index
    %69 = vector.load %arg4[%c0_44, %c5_45, %c0_46] : memref<1x8x128xf32, #tpu.memory_space<vmem>>, vector<1x1x128xf32>
    %70 = vector.shape_cast %69 : vector<1x1x128xf32> to vector<128xf32>
    %71 = vector.shape_cast %70 : vector<128xf32> to vector<1x128xf32>
    %72 = vector.broadcast %71 : vector<1x128xf32> to vector<2x128xf32>
    %73 = arith.addf %68, %72 : vector<2x128xf32>
    %cst_47 = arith.constant 0.000000e+00 : f32
    %74 = vector.broadcast %cst_47 : f32 to vector<2x128xf32>
    %75 = arith.maximumf %73, %74 : vector<2x128xf32>
    %c5_48 = arith.constant 5 : index
    %76 = memref.load %arg5[%c5_48] : memref<8xf32, #tpu.memory_space<smem>>
    %77 = vector.broadcast %76 : f32 to vector<2x128xf32>
    %78 = arith.mulf %75, %77 : vector<2x128xf32>
    %79 = arith.addf %66, %78 : vector<2x128xf32>
    %c0_49 = arith.constant 0 : index
    %c6 = arith.constant 6 : index
    %c0_50 = arith.constant 0 : index
    %c0_51 = arith.constant 0 : index
    %80 = vector.load %arg3[%c0_49, %c6, %c0_50, %c0_51] : memref<1x8x2x128xf32, #tpu.memory_space<vmem>>, vector<1x1x2x128xf32>
    %81 = vector.shape_cast %80 : vector<1x1x2x128xf32> to vector<2x128xf32>
    %c0_52 = arith.constant 0 : index
    %c6_53 = arith.constant 6 : index
    %c0_54 = arith.constant 0 : index
    %82 = vector.load %arg4[%c0_52, %c6_53, %c0_54] : memref<1x8x128xf32, #tpu.memory_space<vmem>>, vector<1x1x128xf32>
    %83 = vector.shape_cast %82 : vector<1x1x128xf32> to vector<128xf32>
    %84 = vector.shape_cast %83 : vector<128xf32> to vector<1x128xf32>
    %85 = vector.broadcast %84 : vector<1x128xf32> to vector<2x128xf32>
    %86 = arith.addf %81, %85 : vector<2x128xf32>
    %cst_55 = arith.constant 0.000000e+00 : f32
    %87 = vector.broadcast %cst_55 : f32 to vector<2x128xf32>
    %88 = arith.maximumf %86, %87 : vector<2x128xf32>
    %c6_56 = arith.constant 6 : index
    %89 = memref.load %arg5[%c6_56] : memref<8xf32, #tpu.memory_space<smem>>
    %90 = vector.broadcast %89 : f32 to vector<2x128xf32>
    %91 = arith.mulf %88, %90 : vector<2x128xf32>
    %92 = arith.addf %79, %91 : vector<2x128xf32>
    %c0_57 = arith.constant 0 : index
    %c7 = arith.constant 7 : index
    %c0_58 = arith.constant 0 : index
    %c0_59 = arith.constant 0 : index
    %93 = vector.load %arg3[%c0_57, %c7, %c0_58, %c0_59] : memref<1x8x2x128xf32, #tpu.memory_space<vmem>>, vector<1x1x2x128xf32>
    %94 = vector.shape_cast %93 : vector<1x1x2x128xf32> to vector<2x128xf32>
    %c0_60 = arith.constant 0 : index
    %c7_61 = arith.constant 7 : index
    %c0_62 = arith.constant 0 : index
    %95 = vector.load %arg4[%c0_60, %c7_61, %c0_62] : memref<1x8x128xf32, #tpu.memory_space<vmem>>, vector<1x1x128xf32>
    %96 = vector.shape_cast %95 : vector<1x1x128xf32> to vector<128xf32>
    %97 = vector.shape_cast %96 : vector<128xf32> to vector<1x128xf32>
    %98 = vector.broadcast %97 : vector<1x128xf32> to vector<2x128xf32>
    %99 = arith.addf %94, %98 : vector<2x128xf32>
    %cst_63 = arith.constant 0.000000e+00 : f32
    %100 = vector.broadcast %cst_63 : f32 to vector<2x128xf32>
    %101 = arith.maximumf %99, %100 : vector<2x128xf32>
    %c7_64 = arith.constant 7 : index
    %102 = memref.load %arg5[%c7_64] : memref<8xf32, #tpu.memory_space<smem>>
    %103 = vector.broadcast %102 : f32 to vector<2x128xf32>
    %104 = arith.mulf %101, %103 : vector<2x128xf32>
    %105 = arith.addf %92, %104 : vector<2x128xf32>
    %106 = vector.broadcast %0 : f32 to vector<2x128xf32>
    %107 = arith.addf %105, %106 : vector<2x128xf32>
    %cst_65 = arith.constant 0.000000e+00 : f32
    %108 = vector.broadcast %cst_65 : f32 to vector<2x128xf32>
    %109 = arith.maximumf %107, %108 : vector<2x128xf32>
    %c0_66 = arith.constant 0 : index
    %c0_67 = arith.constant 0 : index
    %c0_68 = arith.constant 0 : index
    %110 = vector.load %arg7[%c0_66, %c0_67, %c0_68] : memref<1x2x128xf32, #tpu.memory_space<vmem>>, vector<1x2x128xf32>
    %111 = vector.shape_cast %110 : vector<1x2x128xf32> to vector<2x128xf32>
    %112 = vector.shape_cast %109 : vector<2x128xf32> to vector<1x2x128xf32>
    tpu.vector_store %arg7[%c0_66, %c0_67, %c0_68], %112 {strides = array<i32>} : memref<1x2x128xf32, #tpu.memory_space<vmem>>, vector<1x2x128xf32>,
    return
  }
  func.func @transform_0(%arg0: i32, %arg1: i32, %arg2: i32) -> (i32, i32, i32, i32) {
    %c0_i32 = arith.constant 0 : i32
    %c0_i32_0 = arith.constant 0 : i32
    return %arg0, %c0_i32, %arg1, %arg2 : i32, i32, i32, i32
  }
  func.func @transform_1(%arg0: i32, %arg1: i32, %arg2: i32) -> (i32, i32, i32) {
    %c0_i32 = arith.constant 0 : i32
    %c0_i32_0 = arith.constant 0 : i32
    return %arg0, %c0_i32, %arg2 : i32, i32, i32
  }
  func.func @transform_2(%arg0: i32, %arg1: i32, %arg2: i32) -> i32 {
    %c0_i32 = arith.constant 0 : i32
    %c0_i32_0 = arith.constant 0 : i32
    return %c0_i32 : i32
  }
  func.func @transform_3(%arg0: i32, %arg1: i32, %arg2: i32) -> i32 {
    %c0_i32 = arith.constant 0 : i32
    %c0_i32_0 = arith.constant 0 : i32
    return %c0_i32 : i32
  }
  func.func @transform_4(%arg0: i32, %arg1: i32, %arg2: i32) -> (i32, i32, i32) {
    %c0_i32 = arith.constant 0 : i32
    return %arg0, %arg1, %arg2 : i32, i32, i32
  }
}

</mosaic_0001>

<bundles_post_ra>
// kernel: tpu_custom_call.1
= control target key start
LH: loop header
LB: loop body
LE: loop exit
PB: predicated region body
PF: predicated region fallthrough
CT: control target
= control target key end

     0   :  { %s1136_s0 = inlined_call_operand.hbm [shape: f32[2,8,2,128], index: 0, kind: input, shape index: {}]   ;;  %s1137_s1 = inlined_call_operand.hbm [shape: f32[2,8,128], index: 1, kind: input, shape index: {}]   ;;  %s1138_s2 = inlined_call_operand.vmem [shape: f32[8], index: 2, kind: input, shape index: {}]   ;;  %s1139_s3 = inlined_call_operand.<no memory space> [shape: f32[1], index: 3, kind: input, shape index: {}]   ;;  %s1140_s4 = inlined_call_operand.hbm [shape: f32[2,2,128], index: 4, kind: output, shape index: {}]  }
   0x1   :  { %1146 = sst [smem:[#allocation15_spill]] %s1136_s0 }
   0x2   :  { %1147 = sst [smem:[#allocation16_spill]] %s1138_s2 }
   0x3   :  { %9 = sst [smem:[#allocation2]] %s1139_s3 }
   0x4   :  { %10 = vsyncpa [#allocation4], 0 }
   0x5   :  { %12 = vsyncpa [#allocation4 + $0x1], 0 }
   0x6   :  { %13 = vsyncpa [#allocation8], 0 }
   0x7   :  { %15 = vsyncpa [#allocation8 + $0x1], 0 }
   0x8   :  { %16 = vsyncpa [#allocation6], 0 }
   0x9   :  { %17 = vsyncpa [#allocation5], 0 }
   0xa   :  { %19 = vsyncpa [#allocation5 + $0x1], 0  ;;  %s869_s17 = smov 0   ;;  %s871_s18 = smov 0  }
   0xb   :  { %s873_s19 = smov 0   ;;  %s875_s20 = smov 0  }
   0xc   :  { %s877_s21 = smov 0   ;;  %s879_s22 = smov 0  }
   0xd LB: > { %s546_s3 = sadd.s32 4294967295, %s833_s22   ;;  %s547_s23 = sadd.s32 4294967294, %s833_s22   ;;  %s833_s22 = sphi %s879_s22, %s25_s22   ;;  %s829_s21 = sphi %s877_s21, %s1169_s21   ;;  %s825_s20 = sphi %s875_s20, %s1168_s20   ;;  %s821_s19 = sphi %s873_s19, %s1167_s19   ;;  %s817_s18 = sphi %s871_s18, %s1166_s18   ;;  %s813_s17 = sphi %s869_s17, %s1165_s17  }
   0xe   : > { %s55_s24 = sadd.s32 1, %s821_s19  ;;  %p62_p0 = scmp.ne.s32.totalorder %s821_s19, %s817_s18 }
   0xf   : > { %p63_p1 = scmp.eq.s32.totalorder %s833_s22, 0  ;;  %p68_p2 = scmp.ne.s32.totalorder %s817_s18, %s813_s17 }
  0x10   : > { %p907_p3 = scmp.eq.s32.totalorder %s546_s3, 0  ;;  %p166_p4 = scmp.eq.s32.totalorder %s546_s3, 1 }
  0x11   : > { %p911_p5 = por %p63_p1, %p62_p0  ;;  %p172_p6 = scmp.eq.s32.totalorder %s547_s23, 1 }
  0x12   : > { %s1148_s25 = scalar_select %p907_p3, 1, 0 }
  0x13   : > { %p917_p7 = por %p907_p3, %p68_p2  ;;  %p921_p8 = por %p166_p4, %p62_p0 }
  0x14   : > { %p925_p9 = por %p172_p6, %p68_p2  ;;  %p548_p10 = scmp.ge.s32.totalorder %s833_s22, 1 }
  0x15   : > { %s1150_s27 = scalar_select %p917_p7, 1, 0 }
  0x16   : > { %s1151_s28 = scalar_select %p921_p8, 1, 0 }
  0x17   : > { %s1152_s29 = scalar_select %p925_p9, 1, 0 }
  0x18   : > { %p179_p11 = scmp.lt.s32.totalorder %s833_s22, 3  ;;  %s1153_s2 = sld [smem:[#allocation16_spill]] }
  0x19   : > { %p614_p0 = scmp.lt.s32.totalorder %s833_s22, 2  ;;  %s44_s10 = sadd.s32 1, %s829_s21 }
  0x1a   : > { %p934_p12 = pnand %p548_p10, %p179_p11  ;;  %p955_p6 = scmp.ge.s32.totalorder %s44_s10, 2 }
  0x1b   : > { %p944_p2 = pnand %p614_p0, %p911_p5  ;;  %s960_s12 = sand.u32 1, %s821_s19  }
  0x1c   : > { %s1154_s7 = scalar_select %p934_p12, 1, 0 }
  0x1d   : > { %p598_p1 = pneg %p934_p12 }
  0x1e   : > { %s192_s6 = sshll.u32 %s1153_s2, 4  ;;  %s193_s6 = int_to_ptr.vmem [resolvable:$true] %s192_s6 }
  0x1f   : > { %p950_p4 = pnand %p598_p1, %p907_p3  ;;  %s668_s13 = scalar_lea.vmem %s193_s6, 16 }
  0x20   : > { %p669_p10 = scmp.ne.s32.totalorder %s193_s6, %s668_s13  ;;  %p676_p13 = scmp.lt.s32.totalorder %s193_s6, %s193_s6 }
  0x21   : > { %p670_p5 = pneg %p950_p4  ;;  %p677_p9 = scmp.lt.s32.totalorder %s668_s13, %s668_s13 }
  0x23   : > { %p671_p11 = pnand %p670_p5, %p669_p10  ;;  %p678_p1 = por %p677_p9, %p676_p13 }
  0x25   : > { %p672_p0 = pneg %p671_p11 }
  0x27   : > { %p679_p8 = pnand %p678_p1, %p672_p0 }
  0x29   : > { %682 = shalt.err (!%p679_p8)
}
  0x2a   : > { %s835_s14 = smov [#allocation9]   ;;  %s1171_s10 = smov (%p955_p6, %s44_s10), 0 }
  0x2b   : > { %601 = dma.vmem_to_smem (!%p950_p4), %s193_s6, 16, %s835_s14, [#allocation6]  }
  0x2c   : > { %s551_s15 = sshll.u32 %s960_s12, 4  ;;  %s48_s16 = ssub.s32 %s829_s21, %s1171_s10 }
  0x2d   : > { %p53_p8 = scmp.eq.s32.totalorder %s48_s16, 0  ;;  %s587_s3 = sshll.u32 %s829_s21, 8 }
  0x2e   : > { %s1158_s0 = sld [smem:[#allocation15_spill]]  ;;  %s210_s5 = scalar_lea.vmem [#allocation3], %s551_s15 }
  0x2f   : > { %s219_s9 = sshll.u32 %s210_s5, 4  ;;  %s207_s11 = scalar_lea.sflag [#allocation4], %s960_s12  ;;  %s984_s9 = int_to_ptr.vmem [resolvable:$true] %s219_s9 }
  0x30   : > { %s982_s6 = scalar_select %p53_p8, %s821_s19, %s55_s24  }
  0x31   : > { %p685_p13 = pneg %p944_p2 }
  0x34   : > { %s977_s30 = scalar_lea.hbm %s1158_s0, %s587_s3  ;;  %s688_s3 = scalar_lea.hbm %s1158_s0, 512 }
  0x35   : > { %s683_s13 = scalar_lea.hbm %s977_s30, 256  ;;  %p689_p10 = scmp.lt.u32.totalorder %s977_s30, %s1158_s0 }
  0x36   : > { %p684_p9 = scmp.ne.s32.totalorder %s977_s30, %s683_s13  ;;  %p690_p5 = scmp.lt.u32.totalorder %s688_s3, %s683_s13 }
  0x37   : > { %p692_p0 = scmp.lt.u32.totalorder %s683_s13, %s977_s30 }
  0x38   : > { %p686_p4 = pnand %p685_p13, %p684_p9  ;;  %p691_p11 = por %p690_p5, %p689_p10 }
  0x3a   : > { %p687_p6 = pneg %p686_p4  ;;  %p693_p1 = por %p692_p0, %p691_p11 }
  0x3c   : > { %p694_p8 = pnand %p693_p1, %p687_p6 }
  0x3e   : > { %697 = shalt.err (!%p694_p8)
}
  0x3f   : > { %s698_s24 = scalar_lea.vmem %s984_s9, 256  ;;  %s836_s26 = smov [#allocation3]  }
  0x40   : > { %p699_p9 = scmp.ne.s32.totalorder %s984_s9, %s698_s24  ;;  %s703_s5 = sshll.u32 %s836_s26, 4  ;;  %s704_s5 = int_to_ptr.vmem [resolvable:$false] %s703_s5 }
  0x41   : > { %s705_s14 = scalar_lea.vmem %s704_s5, 512  ;;  %p706_p7 = scmp.lt.s32.totalorder %s984_s9, %s704_s5 }
  0x42   : > { %p701_p4 = pnand %p699_p9, %p685_p13  ;;  %p707_p10 = scmp.lt.s32.totalorder %s705_s14, %s698_s24 }
  0x44   : > { %p702_p3 = pneg %p701_p4  ;;  %p708_p5 = por %p707_p10, %p706_p7 }
  0x46   : > { %p709_p11 = pnand %p708_p5, %p702_p3 }
  0x48   : > { %712 = shalt.err (!%p709_p11)
}
  0x49   : > { %s837_s13 = smov 32   ;;  %s838_s16 = smov 2  }
  0x4a   : > { %605 = dma.hbm_to_vmem [thread:$0]  (!%p944_p2), %s977_s30, 256, %s984_s9, %s207_s11, %s837_s13, %s837_s13, %s838_s16  }
  0x4b   : > { %s554_s3 = sshll.u32 %s960_s12, 3  ;;  %s555_s15 = sshll.u32 %s829_s21, 7 }
  0x4c   : > { %s1019_s26 = scalar_lea.hbm %s1137_s1, %s555_s15  ;;  %s233_s5 = scalar_lea.vmem [#allocation7], %s554_s3 }
  0x4d   : > { %s241_s14 = sshll.u32 %s233_s5, 4  ;;  %s230_s0 = scalar_lea.sflag [#allocation8], %s960_s12  ;;  %s242_s14 = int_to_ptr.vmem [resolvable:$true] %s241_s14 }
  0x4e   : > { %s713_s2 = scalar_lea.hbm %s1019_s26, 128  ;;  %s718_s11 = scalar_lea.hbm %s1137_s1, 256 }
  0x4f   : > { %p714_p3 = scmp.ne.s32.totalorder %s1019_s26, %s713_s2  ;;  %p719_p0 = scmp.lt.u32.totalorder %s1019_s26, %s1137_s1 }
  0x50   : > { %p720_p1 = scmp.lt.u32.totalorder %s718_s11, %s713_s2  ;;  %p722_p9 = scmp.lt.u32.totalorder %s713_s2, %s1019_s26 }
  0x51   : > { %p716_p7 = pnand %p714_p3, %p685_p13 }
  0x52   : > { %p721_p8 = por %p720_p1, %p719_p0 }
  0x53   : > { %p717_p6 = pneg %p716_p7 }
  0x54   : > { %p723_p4 = por %p722_p9, %p721_p8 }
  0x56   : > { %p724_p10 = pnand %p723_p4, %p717_p6 }
  0x58   : > { %727 = shalt.err (!%p724_p10)
}
  0x59   : > { %s728_s12 = scalar_lea.vmem %s242_s14, 128  ;;  %s839_s3 = smov [#allocation7]  }
  0x5a   : > { %p729_p5 = scmp.ne.s32.totalorder %s242_s14, %s728_s12  ;;  %s733_s15 = sshll.u32 %s839_s3, 4  ;;  %s734_s15 = int_to_ptr.vmem [resolvable:$false] %s733_s15 }
  0x5b   : > { %s735_s23 = scalar_lea.vmem %s734_s15, 256  ;;  %p736_p7 = scmp.lt.s32.totalorder %s242_s14, %s734_s15 }
  0x5c   : > { %p731_p11 = pnand %p729_p5, %p685_p13  ;;  %p737_p12 = scmp.lt.s32.totalorder %s735_s23, %s728_s12 }
  0x5e   : > { %p732_p3 = pneg %p731_p11  ;;  %p738_p0 = por %p737_p12, %p736_p7 }
  0x60   : > { %p739_p1 = pnand %p738_p0, %p732_p3 }
  0x62   : > { %742 = shalt.err (!%p739_p1)
}
  0x63   : > { %608 = dma.hbm_to_vmem [thread:$0]  (!%p944_p2), %s1019_s26, 128, %s242_s14, %s230_s0  }
  0x64   : > { %p1159_p6 = scmp.ne.s32.totalorder %s1154_s7, 0 }
  0x65   : > { %s1044_s2 = sand.u32 (!%p1159_p6), 1, %s817_s18   ;;  %p1160_p12 = scmp.ne.s32.totalorder (!%p1159_p6), %s1150_s27, 0 }
  0x66   : > { %250 = sbr.rel (%p1159_p6) target bundleno = 159 (0x9f), region = 36  ;;  %s557_s24 = sshll.u32 (!%p1159_p6), %s1044_s2, 4 }
  0x67   : > { %s253_s5 = scalar_lea.sflag (!%p1159_p6), [#allocation4], %s1044_s2  ;;  %s1048_s30 = scalar_lea.vmem (!%p1159_p6), [#allocation3], %s557_s24 }
  0x6d   : > { %796 = dma.done.wait (%p1160_p12), %s253_s5, 256  }
  0x6e   : > { %798 = vsyncadd (%p1160_p12), %s253_s5, 4294967040  ;;  %s558_s0 = sshll.u32 %s1044_s2, 3  ;;  %s262_s7 = scalar_lea.sflag [#allocation8], %s1044_s2 }
  0x6f   : > { %s1056_s8 = scalar_lea.vmem [#allocation7], %s558_s0 }
  0x70   : > { %800 = dma.done.wait (%p1160_p12), %s262_s7, 128  }
  0x71   : > { %802 = vsyncadd (%p1160_p12), %s262_s7, 4294967168  ;;  %p1161_p2 = scmp.ne.s32.totalorder %s1148_s25, 0 }
  0x73   : > { %804 = dma.done.wait (%p1161_p2), [#allocation6], 16  }
  0x74   : > { %806 = vsyncadd (%p1161_p2), [#allocation6], 4294967280 }
  0x75   : > { %274 = sfence }
  0x76   : > { %v301_v0 = vld [vmem:[%s1048_s30] sm:$0x3]  ;;  %s309_s26 = sld [smem:[#allocation9]]  ;;  %v562_v3 = vld [vmem:[%s1048_s30 + $0x2] sm:$0x3]  ;;  %s564_s27 = sld [smem:[#allocation9 + $0x1]] }
  0x77   : > { %v561_v1 = vld [vmem:[%s1056_s8] ss:$0 sm:$0xff]  ;;  %v563_v4 = vld [vmem:[%s1056_s8 + $0x1] ss:$0 sm:$0xff]  ;;  %v565_v6 = vld [vmem:[%s1048_s30 + $0x4] sm:$0x3] }
  0x78   : > { %v307_v2 = vadd.f32 %v561_v1, %v301_v0  ;;  %v320_v5 = vadd.f32 %v563_v4, %v562_v3  ;;  %v566_v7 = vld [vmem:[%s1056_s8 + $0x2] ss:$0 sm:$0xff]  ;;  %s567_s25 = sld [smem:[#allocation9 + $0x2]]  ;;  %v568_v10 = vld [vmem:[%s1048_s30 + $0x6] sm:$0x3]  ;;  %s570_s14 = sld [smem:[#allocation9 + $0x3]] }
  0x79   : > { %v333_v9 = vadd.f32 %v566_v7, %v565_v6  ;;  %v569_v11 = vld [vmem:[%s1056_s8 + $0x3] ss:$0 sm:$0xff]  ;;  %v571_v14 = vld [vmem:[%s1048_s30 + $0x8] sm:$0x3]  ;;  %v572_v16 = vld [vmem:[%s1056_s8 + $0x4] ss:$0 sm:$0xff] }
  0x7a   : > { %v308_v8 = vmax.f32 %v307_v2, 0.0  ;;  %v321_v12 = vmax.f32 %v320_v5, 0.0  ;;  %v346_v13 = vadd.f32 %v569_v11, %v568_v10  ;;  %s573_s9 = sld [smem:[#allocation9 + $0x4]]  ;;  %v359_v19 = vadd.f32 %v572_v16, %v571_v14  ;;  %v574_v20 = vld [vmem:[%s1048_s30 + $0xa] sm:$0x3]  ;;  %s576_s11 = sld [smem:[#allocation9 + $0x5]] }
  0x7b   : > { %v334_v15 = vmax.f32 %v333_v9, 0.0  ;;  %v575_v21 = vld [vmem:[%s1056_s8 + $0x5] ss:$0 sm:$0xff]  ;;  %v577_v25 = vld [vmem:[%s1048_s30 + $0xc] sm:$0x3]  ;;  %s579_s13 = sld [smem:[#allocation9 + $0x6]] }
  0x7c   : > { %v310_v17 = vstv %s309_s26  ;;  %v347_v18 = vmax.f32 %v346_v13, 0.0  ;;  %v323_v23 = vstv %s564_s27  ;;  %v372_v24 = vadd.f32 %v575_v21, %v574_v20  ;;  %v578_v26 = vld [vmem:[%s1056_s8 + $0x6] ss:$0 sm:$0xff]  ;;  %v580_v31 = vld [vmem:[%s1048_s30 + $0xe] sm:$0x3]  ;;  %s582_s16 = sld [smem:[#allocation9 + $0x7]] }
  0x7d   : > { %v311_v22 = vmul.f32 %v310_v17, %v308_v8  ;;  %v324_v27 = vmul.f32 %v323_v23, %v321_v12  ;;  %v360_v29 = vmax.f32 %v359_v19, 0.0  ;;  %v385_v30 = vadd.f32 %v578_v26, %v577_v25  ;;  %v581_v33 = vld [vmem:[%s1056_s8 + $0x7] ss:$0 sm:$0xff]  ;;  %s300_s12 = sld [smem:[#allocation2]]  ;;  %s560_s3 = sshll.u32 %s1044_s2, 1 }
  0x7e   : > { %v336_v28 = vstv %s567_s25  ;;  %v349_v35 = vstv %s570_s14  ;;  %v373_v36 = vmax.f32 %v372_v24, 0.0  ;;  %v398_v37 = vadd.f32 %v581_v33, %v580_v31  ;;  %s299_s15 = scalar_lea.vmem [#allocation10], %s560_s3  ;;  %s584_s24 = sshll.u32 %s825_s20, 5 }
  0x7f   : > { %v337_v32 = vmul.f32 %v336_v28, %v334_v15  ;;  %v325_v34 = vadd.f32 %v324_v27, %v311_v22  ;;  %v350_v38 = vmul.f32 %v349_v35, %v347_v18  ;;  %v386_v42 = vmax.f32 %v385_v30, 0.0  ;;  %s424_s23 = sshll.u32 %s299_s15, 4  ;;  %s1089_s0 = scalar_lea.hbm %s1140_s4, %s584_s24  ;;  %s1084_s23 = int_to_ptr.vmem [resolvable:$true] %s424_s23 }
  0x80   : > { %v362_v39 = vstv %s573_s9  ;;  %v375_v43 = vstv %s576_s11  ;;  %v399_v47 = vmax.f32 %v398_v37, 0.0  ;;  %s409_s7 = scalar_lea.sflag [#allocation5], %s1044_s2  ;;  %s743_s8 = scalar_lea.vmem %s1084_s23, 32 }
  0x81   : > { %v338_v40 = vadd.f32 %v337_v32, %v325_v34  ;;  %v363_v41 = vmul.f32 %v362_v39, %v360_v29  ;;  %v376_v45 = vmul.f32 %v375_v43, %v373_v36  ;;  %v388_v46 = vstv %s579_s13  ;;  %p744_p13 = scmp.ne.s32.totalorder %s1084_s23, %s743_s8  ;;  %p1162_p8 = scmp.ne.s32.totalorder %s1151_s28, 0 }
  0x82   : > { %v401_v48 = vstv %s582_s16  ;;  %v389_v50 = vmul.f32 %v388_v46, %v386_v42  ;;  %s840_s20 = smov [#allocation10]  }
  0x83   : > { %v351_v44 = vadd.f32 %v350_v38, %v338_v40  ;;  %v402_v52 = vmul.f32 %v401_v48, %v399_v47  ;;  %v404_v54 = vstv %s300_s12  ;;  %p745_p9 = pnand %p744_p13, %p1162_p8  ;;  %s747_s26 = sshll.u32 %s840_s20, 4  ;;  %s748_s26 = int_to_ptr.vmem [resolvable:$false] %s747_s26 }
  0x84   : > { %s749_s27 = scalar_lea.vmem %s748_s26, 64  ;;  %p750_p10 = scmp.lt.s32.totalorder %s1084_s23, %s748_s26 }
  0x85   : > { %v364_v49 = vadd.f32 %v363_v41, %v351_v44  ;;  %p746_p4 = pneg %p745_p9  ;;  %p751_p5 = scmp.lt.s32.totalorder %s749_s27, %s743_s8 }
  0x87   : > { %v377_v51 = vadd.f32 %v376_v45, %v364_v49  ;;  %p752_p11 = por %p751_p5, %p750_p10 }
  0x89   : > { %v390_v53 = vadd.f32 %v389_v50, %v377_v51  ;;  %p753_p3 = pnand %p752_p11, %p746_p4 }
  0x8b   : > { %v403_v55 = vadd.f32 %v402_v52, %v390_v53 }
  0x8d   : > { %v405_v56 = vadd.f32 %v404_v54, %v403_v55 }
  0x8f   : > { %v406_v57 = vmax.f32 %v405_v56, 0.0 }
  0x91   : > { %407 = vst [vmem:[%s299_s15] sm:$0x3] %v406_v57 }
  0x92   : > { %756 = shalt.err (!%p753_p3)
}
  0x93   : > { %s757_s2 = scalar_lea.hbm %s1089_s0, 32  ;;  %s761_s9 = scalar_lea.hbm %s1140_s4, 64 }
  0x94   : > { %p758_p7 = scmp.ne.s32.totalorder %s1089_s0, %s757_s2  ;;  %p762_p6 = scmp.lt.u32.totalorder %s1089_s0, %s1140_s4 }
  0x95   : > { %p763_p12 = scmp.lt.u32.totalorder %s761_s9, %s757_s2  ;;  %p765_p13 = scmp.lt.u32.totalorder %s757_s2, %s1089_s0 }
  0x96   : > { %p759_p0 = pnand %p758_p7, %p1162_p8 }
  0x97   : > { %p764_p2 = por %p763_p12, %p762_p6 }
  0x98   : > { %p760_p1 = pneg %p759_p0 }
  0x99   : > { %p766_p9 = por %p765_p13, %p764_p2 }
  0x9b   : > { %p767_p4 = pnand %p766_p9, %p760_p1 }
  0x9d   : > { %770 = shalt.err (!%p767_p4)
}
  0x9e   : > { %596 = dma.vmem_to_hbm [thread:$0]  (%p1162_p8), %s1084_s23, 32, %s1089_s0, %s409_s7  }
  0x9f PF: > { %s436_s16 = sand.u32 1, %s813_s17   ;;  %p1163_p10 = scmp.ne.s32.totalorder %s1152_s29, 0 }
  0xa0   : > { %p1164_p5 = scmp.ge.s32.totalorder %s833_s22, 2  ;;  %s437_s12 = scalar_lea.sflag [#allocation5], %s436_s16 }
  0xa2   : > { %p610_p11 = pnand %p1164_p5, %p1163_p10 }
  0xa4   : > { %808 = dma.done.wait (!%p610_p11), %s437_s12, 32  }
  0xa5   : > { %810 = vsyncadd (!%p610_p11), %s437_s12, 4294967264  ;;  %s25_s22 = sadd.s32 1, %s833_s22   ;;  %s1165_s17 = smov %s817_s18 }
  0xa6   : > { %p22_p3 = scmp.ge.s32.totalorder %s25_s22, 4   ;;  %s1166_s18 = smov %s821_s19 }
  0xa7   : > { %s1167_s19 = smov %s982_s6  ;;  %s1168_s20 = smov %s829_s21 }
  0xa8   : > { %s1169_s21 = smov %s1171_s10  ;;  %24 = sbr.rel (!%p22_p3) target bundleno = 13 (0xd), region = 106 }
  0xaf   :  { %442 = vsyncpa [#allocation4], 1 }
  0xb0   :  { %444 = vsyncpa [#allocation4 + $0x1], 1 }
  0xb1   :  { %445 = vsyncpa [#allocation8], 1 }
  0xb2   :  { %447 = vsyncpa [#allocation8 + $0x1], 1 }
  0xb3   :  { %448 = vsyncpa [#allocation5], 1 }
  0xb4   :  { %450 = vsyncpa [#allocation5 + $0x1], 1 }
  0xb5   :  { %451 = vsyncpa [#allocation6], 1 }
  0xb6   :  { %453 = vsyncpa [#allocation6 + $0x1], 1 }

</bundles_post_ra>
